<compile_context>
chip_gen: v6e
topology: v6e:2x2x1
jax: 0.10.0
libtpu: 0.0.40
codegen_flags: <defaults>
</compile_context>

<pallas_src>
import math

import jax
import jax.numpy as jnp
import numpy as np
from jax.experimental import pallas as pl
from jax.experimental.pallas import tpu as pltpu

HIDDEN = 8          # hidden_size
INPUT = 5           # input_size = x_seq.size(2)
SEQ = 5             # sequense_length
NUM_LAYERS = 2      # num_layers (two explicit layers in the kernel)
BATCH = 2

BP = 8              # batch padded to one sublane group (8 rows)
IP = 8              # input dim padded to one sublane group (contraction alignment)

# Packed-slab row layout (columns = HIDDEN lanes):
#   rows  0: 8        -> W_ih0^T padded          (IP, H)  (rows INPUT..7 zero)
#   rows  8:16        -> W_hh0^T                 (H, H)
#   rows 16:24        -> W_ih1^T                 (H, H)
#   rows 24:32        -> W_hh1^T                 (H, H)
#   rows 32:32+T*BP   -> W_fc pre-broadcast      (T*BP, H) (row group t = wfc[t, :] x8)
#   row  72           -> b0 = b_ih0 + b_hh0      (H,)
#   row  73           -> b1 = b_ih1 + b_hh1      (H,)
#   row  74, col 0    -> b_fc scalar
ROW_WIH0 = 0
ROW_WHH0 = 8
ROW_WIH1 = 16
ROW_WHH1 = 24
ROW_WFC = 32
ROW_B0 = ROW_WFC + SEQ * BP      # 72
ROW_B1 = ROW_B0 + 1              # 73
ROW_BFC = ROW_B1 + 1             # 74
SLAB_ROWS = 80                   # padded to a multiple of 8 sublanes


def make_kernel(T, H):
    def kernel(x_ref, w_ref, out_ref, h1s_ref):
        """x_ref: (T*BP, IP) time-major padded; w_ref: (80, H) slab;
        out_ref: (BP, 1); h1s_ref: (T*BP, H) VMEM scratch."""
        # Static, pre-transposed views into the packed weight slab.
        wih0T = w_ref[ROW_WIH0:ROW_WIH0 + IP, :]          # (IP, H)
        whh0T = w_ref[ROW_WHH0:ROW_WHH0 + H, :]           # (H, H)
        wih1T = w_ref[ROW_WIH1:ROW_WIH1 + H, :]           # (H, H)
        whh1T = w_ref[ROW_WHH1:ROW_WHH1 + H, :]           # (H, H)
        wfc_b = w_ref[ROW_WFC:ROW_WFC + T * BP, :]        # (T*BP, H) pre-broadcast
        b0 = w_ref[ROW_B0:ROW_B0 + 1, :]                  # (1, H)
        b1b = jnp.broadcast_to(w_ref[ROW_B1:ROW_B1 + 1, :], (BP, H))   # hoisted once
        bfc = w_ref[ROW_BFC:ROW_BFC + 1, 0:1]             # (1, 1)

        # Layer-0 input projection for ALL timesteps in one matmul (off the serial chain).
        xproj = jnp.dot(x_ref[...], wih0T,
                        preferred_element_type=jnp.float32) + b0       # (T*BP, H)

        h0 = jnp.zeros((BP, H), jnp.float32)
        h1 = jnp.zeros((BP, H), jnp.float32)

        # T is small & static -> unrolled; all slices/stores are aligned 8-row vreg groups.
        for t in range(T):
            xp_t = xproj[t * BP:(t + 1) * BP, :]                        # aligned (BP, H)
            # Layer 0: single matmul on the recurrent chain.
            h0 = jnp.tanh(xp_t + jnp.dot(h0, whh0T,
                                         preferred_element_type=jnp.float32))
            # Layer 1: de-fused — h1 @ whh1T depends only on h1_{t-1}, so it can issue
            # while layer-0's tanh for this step is still in flight. No lane concat.
            h1 = jnp.tanh(jnp.dot(h0, wih1T, preferred_element_type=jnp.float32)
                          + jnp.dot(h1, whh1T, preferred_element_type=jnp.float32)
                          + b1b)
            # FC head: just store h1_t (aligned), everything else happens after the loop.
            h1s_ref[t * BP:(t + 1) * BP, :] = h1

        # FC head: one VPU multiply against pre-broadcast weights, sublane-group adds,
        # then a single XLU lane reduce. No per-step broadcasts or matmuls.
        prod = h1s_ref[...] * wfc_b                                     # (T*BP, H)
        acc = prod[0:BP, :]
        for t in range(1, T):
            acc = acc + prod[t * BP:(t + 1) * BP, :]                    # (BP, H)
        logit = jnp.sum(acc, axis=-1, keepdims=True)                    # (BP, 1)
        # TODO(synk): output stays (BP, 1) (masked lane store); lane-dense packing only
        # pays off once many sequences are batched per call.
        out_ref[...] = jax.nn.sigmoid(logit + bfc)

    return kernel


def vanilla_rnn_forward(x, packed_w):
    """x: (B, T, I) batch_first like PyTorch; packed_w: (80, H) slab."""
    B, T, I = x.shape
    H = packed_w.shape[1]
    # Host-side layout plumbing: pad batch->BP rows and input->IP cols with zeros and
    # go time-major 2D, so every in-kernel per-t access is an aligned static row group.
    x_pad = jnp.zeros((T, BP, IP), jnp.float32)
    x_pad = x_pad.at[:, :B, :I].set(jnp.transpose(x, (1, 0, 2)))
    x2d = x_pad.reshape(T * BP, IP)

    out = pl.pallas_call(
        make_kernel(T, H),
        out_shape=jax.ShapeDtypeStruct((BP, 1), jnp.float32),
        in_specs=[pl.BlockSpec(memory_space=pltpu.MemorySpace.VMEM),
                  pl.BlockSpec(memory_space=pltpu.MemorySpace.VMEM)],
        out_specs=pl.BlockSpec(memory_space=pltpu.MemorySpace.VMEM),
        scratch_shapes=[pltpu.VMEM((T * BP, H), jnp.float32)],
    )(x2d, packed_w)
    # Padded batch rows carry garbage (bias propagated through tanh) — slice them off.
    return out[:B, :]


def init_params(key):
    """Deterministic init mirroring PyTorch's U(-1/sqrt(fan), 1/sqrt(fan))."""
    ks = jax.random.split(key, 11)
    k_rnn = 1.0 / math.sqrt(HIDDEN)
    u = lambda k, shape, b: jax.random.uniform(k, shape, jnp.float32, -b, b)

    wih0 = u(ks[0], (HIDDEN, INPUT), k_rnn)
    whh0 = u(ks[1], (HIDDEN, HIDDEN), k_rnn)
    bih0 = u(ks[2], (HIDDEN,), k_rnn)
    bhh0 = u(ks[3], (HIDDEN,), k_rnn)

    wih1 = u(ks[4], (HIDDEN, HIDDEN), k_rnn)
    whh1 = u(ks[5], (HIDDEN, HIDDEN), k_rnn)
    bih1 = u(ks[6], (HIDDEN,), k_rnn)
    bhh1 = u(ks[7], (HIDDEN,), k_rnn)

    k_fc = 1.0 / math.sqrt(HIDDEN * SEQ)
    wfc = u(ks[8], (1, HIDDEN * SEQ), k_fc)
    bfc = u(ks[9], (1, 1), k_fc)

    # Fuse the two RNN biases per layer (they are always summed).
    b0 = (bih0 + bhh0).reshape(1, HIDDEN)
    b1 = (bih1 + bhh1).reshape(1, HIDDEN)
    return (wih0, whh0, b0, wih1, whh1, b1, wfc, bfc)


def pack_params(params):
    """Pre-transpose + pad + pre-broadcast all weights/biases into one (80, H) f32 slab."""
    (wih0, whh0, b0, wih1, whh1, b1, wfc, bfc) = params
    H, I, T = HIDDEN, INPUT, SEQ
    slab = jnp.zeros((SLAB_ROWS, H), jnp.float32)
    slab = slab.at[ROW_WIH0:ROW_WIH0 + I, :].set(wih0.T)      # rows I..7 stay zero (pad)
    slab = slab.at[ROW_WHH0:ROW_WHH0 + H, :].set(whh0.T)
    slab = slab.at[ROW_WIH1:ROW_WIH1 + H, :].set(wih1.T)
    slab = slab.at[ROW_WHH1:ROW_WHH1 + H, :].set(whh1.T)
    wfc_rows = jnp.repeat(wfc.reshape(T, H), BP, axis=0)      # (T*BP, H) pre-broadcast
    slab = slab.at[ROW_WFC:ROW_WFC + T * BP, :].set(wfc_rows)
    slab = slab.at[ROW_B0, :].set(b0.reshape(H))
    slab = slab.at[ROW_B1, :].set(b1.reshape(H))
    slab = slab.at[ROW_BFC, 0].set(bfc[0, 0])
    return slab


def reference_forward(x, params):
    """Pure-JAX reference matching PyTorch nn.RNN(tanh) + Linear + Sigmoid."""
    (wih0, whh0, b0, wih1, whh1, b1, wfc, bfc) = params
    B, T, _ = x.shape
    h0 = jnp.zeros((B, HIDDEN), jnp.float32)
    h1 = jnp.zeros((B, HIDDEN), jnp.float32)
    outs = []
    for t in range(T):
        xt = x[:, t, :]
        h0 = jnp.tanh(xt @ wih0.T + h0 @ whh0.T + b0)
        h1 = jnp.tanh(h0 @ wih1.T + h1 @ whh1.T + b1)
        outs.append(h1)
    out = jnp.stack(outs, axis=1).reshape(B, T * HIDDEN)   # (B, T*H)
    return jax.nn.sigmoid(out @ wfc.T + bfc)


if __name__ == "__main__":
    key = jax.random.PRNGKey(0)
    k_x, k_p = jax.random.split(key)

    x = jax.random.normal(k_x, (BATCH, SEQ, INPUT), dtype=jnp.float32)
    params = init_params(k_p)
    packed_w = pack_params(params)

    out = vanilla_rnn_forward(x, packed_w)
    out = jax.block_until_ready(out)

    ref = reference_forward(x, params)
    assert out.shape == (BATCH, 1)
    np.testing.assert_allclose(np.asarray(out), np.asarray(ref), rtol=1e-5, atol=1e-5)

    print("KERNEL_OK")
</pallas_src>

<mosaic_0001>
module attributes {stable_mosaic.version = 11 : i64} {
  func.func @kernel(%arg0: memref<40x8xf32, #tpu.memory_space<vmem>>, %arg1: memref<80x8xf32, #tpu.memory_space<vmem>>, %arg2: memref<8x1xf32, #tpu.memory_space<vmem>>, %arg3: memref<40x8xf32, #tpu.memory_space<vmem>>) attributes {dimension_semantics = [], scalar_prefetch = 0 : i64, scratch_operands = 1 : i64, tpu.core_type = #tpu.core_type<tc>} {
    %c0 = arith.constant 0 : index
    %c0_0 = arith.constant 0 : index
    %0 = vector.load %arg1[%c0, %c0_0] : memref<80x8xf32, #tpu.memory_space<vmem>>, vector<8x8xf32>
    %c8 = arith.constant 8 : index
    %c0_1 = arith.constant 0 : index
    %1 = vector.load %arg1[%c8, %c0_1] : memref<80x8xf32, #tpu.memory_space<vmem>>, vector<8x8xf32>
    %c16 = arith.constant 16 : index
    %c0_2 = arith.constant 0 : index
    %2 = vector.load %arg1[%c16, %c0_2] : memref<80x8xf32, #tpu.memory_space<vmem>>, vector<8x8xf32>
    %c24 = arith.constant 24 : index
    %c0_3 = arith.constant 0 : index
    %3 = vector.load %arg1[%c24, %c0_3] : memref<80x8xf32, #tpu.memory_space<vmem>>, vector<8x8xf32>
    %c32 = arith.constant 32 : index
    %c0_4 = arith.constant 0 : index
    %4 = vector.load %arg1[%c32, %c0_4] : memref<80x8xf32, #tpu.memory_space<vmem>>, vector<40x8xf32>
    %c72 = arith.constant 72 : index
    %c0_5 = arith.constant 0 : index
    %5 = vector.load %arg1[%c72, %c0_5] : memref<80x8xf32, #tpu.memory_space<vmem>>, vector<1x8xf32>
    %c73 = arith.constant 73 : index
    %c0_6 = arith.constant 0 : index
    %6 = vector.load %arg1[%c73, %c0_6] : memref<80x8xf32, #tpu.memory_space<vmem>>, vector<1x8xf32>
    %7 = vector.shape_cast %6 : vector<1x8xf32> to vector<1x8xf32>
    %8 = vector.broadcast %7 : vector<1x8xf32> to vector<8x8xf32>
    %c74 = arith.constant 74 : index
    %c0_7 = arith.constant 0 : index
    %9 = vector.load %arg1[%c74, %c0_7] : memref<80x8xf32, #tpu.memory_space<vmem>>, vector<1x1xf32>
    %c0_8 = arith.constant 0 : index
    %c0_9 = arith.constant 0 : index
    %10 = vector.load %arg0[%c0_8, %c0_9] : memref<40x8xf32, #tpu.memory_space<vmem>>, vector<40x8xf32>
    %cst = arith.constant dense<0.000000e+00> : vector<40x8xf32>
    %11 = tpu.matmul %10, %0, %cst {dimension_numbers = #tpu.dot_dimension_numbers<[1], [0], [0], [1], [0, 0, 1, 1], [], []>} : vector<40x8xf32>, vector<8x8xf32>, vector<40x8xf32> -> vector<40x8xf32>
    %12 = vector.broadcast %5 : vector<1x8xf32> to vector<40x8xf32>
    %13 = arith.addf %11, %12 : vector<40x8xf32>
    %cst_10 = arith.constant 0.000000e+00 : f32
    %14 = vector.broadcast %cst_10 : f32 to vector<8x8xf32>
    %cst_11 = arith.constant 0.000000e+00 : f32
    %15 = vector.broadcast %cst_11 : f32 to vector<8x8xf32>
    %16 = vector.extract_strided_slice %13 {offsets = [0, 0], sizes = [8, 8], strides = [1, 1]} : vector<40x8xf32> to vector<8x8xf32>
    %cst_12 = arith.constant dense<0.000000e+00> : vector<8x8xf32>
    %17 = tpu.matmul %14, %1, %cst_12 {dimension_numbers = #tpu.dot_dimension_numbers<[1], [0], [0], [1], [0, 0, 1, 1], [], []>} : vector<8x8xf32>, vector<8x8xf32>, vector<8x8xf32> -> vector<8x8xf32>
    %18 = arith.addf %16, %17 : vector<8x8xf32>
    %19 = math.tanh %18 : vector<8x8xf32>
    %cst_13 = arith.constant dense<0.000000e+00> : vector<8x8xf32>
    %20 = tpu.matmul %19, %2, %cst_13 {dimension_numbers = #tpu.dot_dimension_numbers<[1], [0], [0], [1], [0, 0, 1, 1], [], []>} : vector<8x8xf32>, vector<8x8xf32>, vector<8x8xf32> -> vector<8x8xf32>
    %cst_14 = arith.constant dense<0.000000e+00> : vector<8x8xf32>
    %21 = tpu.matmul %15, %3, %cst_14 {dimension_numbers = #tpu.dot_dimension_numbers<[1], [0], [0], [1], [0, 0, 1, 1], [], []>} : vector<8x8xf32>, vector<8x8xf32>, vector<8x8xf32> -> vector<8x8xf32>
    %22 = arith.addf %20, %21 : vector<8x8xf32>
    %23 = arith.addf %22, %8 : vector<8x8xf32>
    %24 = math.tanh %23 : vector<8x8xf32>
    %c0_15 = arith.constant 0 : index
    %c0_16 = arith.constant 0 : index
    %25 = vector.load %arg3[%c0_15, %c0_16] : memref<40x8xf32, #tpu.memory_space<vmem>>, vector<8x8xf32>
    tpu.vector_store %arg3[%c0_15, %c0_16], %24 {strides = array<i32>} : memref<40x8xf32, #tpu.memory_space<vmem>>, vector<8x8xf32>,
    %26 = vector.extract_strided_slice %13 {offsets = [8, 0], sizes = [8, 8], strides = [1, 1]} : vector<40x8xf32> to vector<8x8xf32>
    %cst_17 = arith.constant dense<0.000000e+00> : vector<8x8xf32>
    %27 = tpu.matmul %19, %1, %cst_17 {dimension_numbers = #tpu.dot_dimension_numbers<[1], [0], [0], [1], [0, 0, 1, 1], [], []>} : vector<8x8xf32>, vector<8x8xf32>, vector<8x8xf32> -> vector<8x8xf32>
    %28 = arith.addf %26, %27 : vector<8x8xf32>
    %29 = math.tanh %28 : vector<8x8xf32>
    %cst_18 = arith.constant dense<0.000000e+00> : vector<8x8xf32>
    %30 = tpu.matmul %29, %2, %cst_18 {dimension_numbers = #tpu.dot_dimension_numbers<[1], [0], [0], [1], [0, 0, 1, 1], [], []>} : vector<8x8xf32>, vector<8x8xf32>, vector<8x8xf32> -> vector<8x8xf32>
    %cst_19 = arith.constant dense<0.000000e+00> : vector<8x8xf32>
    %31 = tpu.matmul %24, %3, %cst_19 {dimension_numbers = #tpu.dot_dimension_numbers<[1], [0], [0], [1], [0, 0, 1, 1], [], []>} : vector<8x8xf32>, vector<8x8xf32>, vector<8x8xf32> -> vector<8x8xf32>
    %32 = arith.addf %30, %31 : vector<8x8xf32>
    %33 = arith.addf %32, %8 : vector<8x8xf32>
    %34 = math.tanh %33 : vector<8x8xf32>
    %c8_20 = arith.constant 8 : index
    %c0_21 = arith.constant 0 : index
    %35 = vector.load %arg3[%c8_20, %c0_21] : memref<40x8xf32, #tpu.memory_space<vmem>>, vector<8x8xf32>
    tpu.vector_store %arg3[%c8_20, %c0_21], %34 {strides = array<i32>} : memref<40x8xf32, #tpu.memory_space<vmem>>, vector<8x8xf32>,
    %36 = vector.extract_strided_slice %13 {offsets = [16, 0], sizes = [8, 8], strides = [1, 1]} : vector<40x8xf32> to vector<8x8xf32>
    %cst_22 = arith.constant dense<0.000000e+00> : vector<8x8xf32>
    %37 = tpu.matmul %29, %1, %cst_22 {dimension_numbers = #tpu.dot_dimension_numbers<[1], [0], [0], [1], [0, 0, 1, 1], [], []>} : vector<8x8xf32>, vector<8x8xf32>, vector<8x8xf32> -> vector<8x8xf32>
    %38 = arith.addf %36, %37 : vector<8x8xf32>
    %39 = math.tanh %38 : vector<8x8xf32>
    %cst_23 = arith.constant dense<0.000000e+00> : vector<8x8xf32>
    %40 = tpu.matmul %39, %2, %cst_23 {dimension_numbers = #tpu.dot_dimension_numbers<[1], [0], [0], [1], [0, 0, 1, 1], [], []>} : vector<8x8xf32>, vector<8x8xf32>, vector<8x8xf32> -> vector<8x8xf32>
    %cst_24 = arith.constant dense<0.000000e+00> : vector<8x8xf32>
    %41 = tpu.matmul %34, %3, %cst_24 {dimension_numbers = #tpu.dot_dimension_numbers<[1], [0], [0], [1], [0, 0, 1, 1], [], []>} : vector<8x8xf32>, vector<8x8xf32>, vector<8x8xf32> -> vector<8x8xf32>
    %42 = arith.addf %40, %41 : vector<8x8xf32>
    %43 = arith.addf %42, %8 : vector<8x8xf32>
    %44 = math.tanh %43 : vector<8x8xf32>
    %c16_25 = arith.constant 16 : index
    %c0_26 = arith.constant 0 : index
    %45 = vector.load %arg3[%c16_25, %c0_26] : memref<40x8xf32, #tpu.memory_space<vmem>>, vector<8x8xf32>
    tpu.vector_store %arg3[%c16_25, %c0_26], %44 {strides = array<i32>} : memref<40x8xf32, #tpu.memory_space<vmem>>, vector<8x8xf32>,
    %46 = vector.extract_strided_slice %13 {offsets = [24, 0], sizes = [8, 8], strides = [1, 1]} : vector<40x8xf32> to vector<8x8xf32>
    %cst_27 = arith.constant dense<0.000000e+00> : vector<8x8xf32>
    %47 = tpu.matmul %39, %1, %cst_27 {dimension_numbers = #tpu.dot_dimension_numbers<[1], [0], [0], [1], [0, 0, 1, 1], [], []>} : vector<8x8xf32>, vector<8x8xf32>, vector<8x8xf32> -> vector<8x8xf32>
    %48 = arith.addf %46, %47 : vector<8x8xf32>
    %49 = math.tanh %48 : vector<8x8xf32>
    %cst_28 = arith.constant dense<0.000000e+00> : vector<8x8xf32>
    %50 = tpu.matmul %49, %2, %cst_28 {dimension_numbers = #tpu.dot_dimension_numbers<[1], [0], [0], [1], [0, 0, 1, 1], [], []>} : vector<8x8xf32>, vector<8x8xf32>, vector<8x8xf32> -> vector<8x8xf32>
    %cst_29 = arith.constant dense<0.000000e+00> : vector<8x8xf32>
    %51 = tpu.matmul %44, %3, %cst_29 {dimension_numbers = #tpu.dot_dimension_numbers<[1], [0], [0], [1], [0, 0, 1, 1], [], []>} : vector<8x8xf32>, vector<8x8xf32>, vector<8x8xf32> -> vector<8x8xf32>
    %52 = arith.addf %50, %51 : vector<8x8xf32>
    %53 = arith.addf %52, %8 : vector<8x8xf32>
    %54 = math.tanh %53 : vector<8x8xf32>
    %c24_30 = arith.constant 24 : index
    %c0_31 = arith.constant 0 : index
    %55 = vector.load %arg3[%c24_30, %c0_31] : memref<40x8xf32, #tpu.memory_space<vmem>>, vector<8x8xf32>
    tpu.vector_store %arg3[%c24_30, %c0_31], %54 {strides = array<i32>} : memref<40x8xf32, #tpu.memory_space<vmem>>, vector<8x8xf32>,
    %56 = vector.extract_strided_slice %13 {offsets = [32, 0], sizes = [8, 8], strides = [1, 1]} : vector<40x8xf32> to vector<8x8xf32>
    %cst_32 = arith.constant dense<0.000000e+00> : vector<8x8xf32>
    %57 = tpu.matmul %49, %1, %cst_32 {dimension_numbers = #tpu.dot_dimension_numbers<[1], [0], [0], [1], [0, 0, 1, 1], [], []>} : vector<8x8xf32>, vector<8x8xf32>, vector<8x8xf32> -> vector<8x8xf32>
    %58 = arith.addf %56, %57 : vector<8x8xf32>
    %59 = math.tanh %58 : vector<8x8xf32>
    %cst_33 = arith.constant dense<0.000000e+00> : vector<8x8xf32>
    %60 = tpu.matmul %59, %2, %cst_33 {dimension_numbers = #tpu.dot_dimension_numbers<[1], [0], [0], [1], [0, 0, 1, 1], [], []>} : vector<8x8xf32>, vector<8x8xf32>, vector<8x8xf32> -> vector<8x8xf32>
    %cst_34 = arith.constant dense<0.000000e+00> : vector<8x8xf32>
    %61 = tpu.matmul %54, %3, %cst_34 {dimension_numbers = #tpu.dot_dimension_numbers<[1], [0], [0], [1], [0, 0, 1, 1], [], []>} : vector<8x8xf32>, vector<8x8xf32>, vector<8x8xf32> -> vector<8x8xf32>
    %62 = arith.addf %60, %61 : vector<8x8xf32>
    %63 = arith.addf %62, %8 : vector<8x8xf32>
    %64 = math.tanh %63 : vector<8x8xf32>
    %c32_35 = arith.constant 32 : index
    %c0_36 = arith.constant 0 : index
    %65 = vector.load %arg3[%c32_35, %c0_36] : memref<40x8xf32, #tpu.memory_space<vmem>>, vector<8x8xf32>
    tpu.vector_store %arg3[%c32_35, %c0_36], %64 {strides = array<i32>} : memref<40x8xf32, #tpu.memory_space<vmem>>, vector<8x8xf32>,
    %c0_37 = arith.constant 0 : index
    %c0_38 = arith.constant 0 : index
    %66 = vector.load %arg3[%c0_37, %c0_38] : memref<40x8xf32, #tpu.memory_space<vmem>>, vector<40x8xf32>
    %67 = arith.mulf %66, %4 : vector<40x8xf32>
    %68 = vector.extract_strided_slice %67 {offsets = [0, 0], sizes = [8, 8], strides = [1, 1]} : vector<40x8xf32> to vector<8x8xf32>
    %69 = vector.extract_strided_slice %67 {offsets = [8, 0], sizes = [8, 8], strides = [1, 1]} : vector<40x8xf32> to vector<8x8xf32>
    %70 = arith.addf %68, %69 : vector<8x8xf32>
    %71 = vector.extract_strided_slice %67 {offsets = [16, 0], sizes = [8, 8], strides = [1, 1]} : vector<40x8xf32> to vector<8x8xf32>
    %72 = arith.addf %70, %71 : vector<8x8xf32>
    %73 = vector.extract_strided_slice %67 {offsets = [24, 0], sizes = [8, 8], strides = [1, 1]} : vector<40x8xf32> to vector<8x8xf32>
    %74 = arith.addf %72, %73 : vector<8x8xf32>
    %75 = vector.extract_strided_slice %67 {offsets = [32, 0], sizes = [8, 8], strides = [1, 1]} : vector<40x8xf32> to vector<8x8xf32>
    %76 = arith.addf %74, %75 : vector<8x8xf32>
    %cst_39 = arith.constant dense<0.000000e+00> : vector<8xf32>
    %77 = vector.multi_reduction <add>, %76, %cst_39 [1] : vector<8x8xf32> to vector<8xf32>
    %78 = vector.shape_cast %77 : vector<8xf32> to vector<8x1xf32>
    %79 = vector.broadcast %9 : vector<1x1xf32> to vector<8x1xf32>
    %80 = arith.addf %78, %79 : vector<8x1xf32>
    %81 = arith.negf %80 : vector<8x1xf32>
    %82 = math.exp %81 : vector<8x1xf32>
    %cst_40 = arith.constant 1.000000e+00 : f32
    %83 = vector.broadcast %cst_40 : f32 to vector<8x1xf32>
    %84 = arith.addf %83, %82 : vector<8x1xf32>
    %85 = arith.divf %83, %84 : vector<8x1xf32>
    %c0_41 = arith.constant 0 : index
    %c0_42 = arith.constant 0 : index
    %86 = vector.load %arg2[%c0_41, %c0_42] : memref<8x1xf32, #tpu.memory_space<vmem>>, vector<8x1xf32>
    tpu.vector_store %arg2[%c0_41, %c0_42], %85 {strides = array<i32>} : memref<8x1xf32, #tpu.memory_space<vmem>>, vector<8x1xf32>,
    return
  }
}

</mosaic_0001>

<bundles_post_ra>
// kernel: tpu_custom_call.1
= control target key start
LH: loop header
LB: loop body
LE: loop exit
PB: predicated region body
PF: predicated region fallthrough
CT: control target
= control target key end

     0   :  { %v1457_v0 = vmov 0.0   ;;  %vm36_vm0 = vcmask 64512   ;;  %vm1458_vm1 = vmmov 0   ;;  %vm1275_vm2 = vcmask 7168   ;;  %s1645_s1 = inlined_call_operand.vmem [shape: f32[80,8], index: 1, kind: input, shape index: {}]   ;;  %s1646_s0 = inlined_call_operand.vmem [shape: f32[40,8], index: 0, kind: input, shape index: {}]   ;;  %s1647_s2 = inlined_call_operand.vmem [shape: f32[8,1], index: 2, kind: output, shape index: {}]  }
   0x1   :  { %1339 = vmatprep.subr.mxu0 %v1457_v0  ;;  %1356 = vmatprep.subr.mxu1 %v1457_v0  ;;  %v11_v1 = vld [vmem:[%s1645_s1] sm:$0xff]  ;;  %v1482_v2 = vld [vmem:[%s1645_s1 + $0x8] sm:$0xff]  ;;  %v1503_v4 = vld [vmem:[%s1645_s1 + $0x18] sm:$0xff] }
   0x2   :  { %v27_v3 = vld [vmem:[%s1646_s0] sm:$0xff]  ;;  %1340 = vmatpush3.msra.mxu0 %v11_v1  ;;  %1341 = vmatprep.mubr.msk.f32.mxu0 %vm1458_vm1, %v1457_v0  ;;  %v1508_v5 = vld [vmem:[%s1645_s1 + $0x10] sm:$0xff]  ;;  %v28_v6 = vld [vmem:[%s1646_s0 + $0x8] sm:$0xff] }
   0x3   :  { %1357 = vmatpush3.msra.mxu1 %v1482_v2  ;;  %1358 = vmatprep.mubr.msk.f32.mxu1 %vm1458_vm1, %v1457_v0  ;;  %v1528_v7 = vld [vmem:[%s1645_s1 + $0x48] ss:$0 sm:$0xff]  ;;  %v29_v19 = vld [vmem:[%s1646_s0 + $0x10] sm:$0xff]  ;;  %v30_v20 = vld [vmem:[%s1646_s0 + $0x18] sm:$0xff] }
   0x4   :  { %1342 = vmatmul.mubr.msk.f32.vlgmr.msra.gmra.mxu0 %vm36_vm0, %v27_v3  ;;  %1359 = vmatmul.mubr.f32.vlgmr.msra.gmra.mxu1 %v1457_v0  ;;  %v31_v21 = vld [vmem:[%s1646_s0 + $0x20] sm:$0xff]  ;;  %v1562_v22 = vld [vmem:[%s1645_s1 + $0x49] ss:$0 sm:$0xff] }
   0x5   :  { %1361 = vmatprep.subr.mxu1 %v1457_v0  ;;  %1363 = vmatprep.mubr.msk.f32.mxu1 %vm1458_vm1, %v1457_v0 }
   0x6   :  { %1344 = vmatprep.mubr.msk.f32.mxu0 %vm1458_vm1, %v1457_v0  ;;  %1381 = vmatprep.subr.mxu0 %v1457_v0 }
   0x7   :  { %1362 = vmatpush3.msra.mxu1 %v1503_v4  ;;  %1382 = vmatpush3.msra.mxu0 %v1508_v5 }
   0x8   :  { %1345 = vmatmul.mubr.msk.f32.gmra.mxu0 %vm36_vm0, %v28_v6  ;;  %1364 = vmatmul.mubr.f32.vlgmr.msra.gmra.mxu1 %v1457_v0 }
   0x9   :  { %1366 = vmatprep.subr.mxu1 %v1457_v0  ;;  %1368 = vmatprep.mubr.msk.f32.mxu1 %vm1458_vm1, %v1457_v0 }
   0xa   :  { %1367 = vmatpush3.msra.mxu1 %v1508_v5  ;;  %1347 = vmatprep.mubr.msk.f32.mxu0 %vm1458_vm1, %v1457_v0 }
   0xb   :  { %1371 = vmatprep.subr.mxu1 %v1457_v0  ;;  %1391 = vmatprep.subr.mxu0 %v1457_v0 }
   0xc   :  { %1348 = vmatmul.mubr.msk.f32.gmra.mxu0 %vm36_vm0, %v29_v19  ;;  %v15_v19 = vld [vmem:[%s1645_s1 + $0x20] sm:$0xff] }
   0xd   :  { %1350 = vmatprep.mubr.msk.f32.mxu0 %vm1458_vm1, %v1457_v0 }
  0x10   :  { %1351 = vmatmul.mubr.msk.f32.gmra.mxu0 %vm36_vm0, %v30_v20 }
  0x11   :  { %1353 = vmatprep.mubr.msk.f32.mxu0 %vm1458_vm1, %v1457_v0 }
  0x14   :  { %1354 = vmatmul.mubr.msk.f32.gmra.mxu0 %vm36_vm0, %v31_v21  ;;  %v17_v21 = vld [vmem:[%s1645_s1 + $0x30] sm:$0xff] }
  0x15   :  { %1383 = vmatprep.mubr.msk.f32.mxu0 %vm1458_vm1, %v1457_v0 }
  0xc4   :  { %v118_v8 = vpop.f32.mrf.mxu0  ;;  %v211_v9 = vpop.f32.mrf.mxu1 }
  0xc5   :  { %v119_v10 = vadd.f32 %v1528_v7, %v118_v8 }
  0xc6   :  { %v1343_v11 = vpop.f32.mrf.mxu0  ;;  %v1360_v12 = vpop.f32.mrf.mxu1 }
  0xc7   :  { %v215_v13 = vadd.f32 %v211_v9, %v119_v10 }
  0xc8   :  { %v123_v15 = vpop.f32.mrf.mxu0  ;;  %v283_v16 = vpop.f32.mrf.mxu1 }
  0xc9   :  { %1433 = vtanh.f32 %v215_v13  ;;  %v124_v24 = vadd.f32 %v1528_v7, %v123_v15 }
  0xca   :  { %v1346_v17 = vpop.f32.mrf.mxu0  ;;  %v1365_v18 = vpop.f32.mrf.mxu1 }
  0xcb   :  { %v16_v17 = vld [vmem:[%s1645_s1 + $0x28] sm:$0xff] }
  0xcc   :  { %v128_v33 = vpop.f32.mrf.mxu0 }
  0xcd   :  { %v129_v42 = vadd.f32 %v1528_v7, %v128_v33 }
  0xce   :  { %v1349_v34 = vpop.f32.mrf.mxu0 }
  0xd0   :  { %v133_v35 = vpop.f32.mrf.mxu0 }
  0xd1   :  { %v134_v55 = vadd.f32 %v1528_v7, %v133_v35 }
  0xd2   :  { %v1352_v36 = vpop.f32.mrf.mxu0 }
  0xd4   :  { %v138_v37 = vpop.f32.mrf.mxu0 }
  0xd5   :  { %v139_v6 = vadd.f32 %v1528_v7, %v138_v37 }
  0xd6   :  { %v1434_v14 = vpop.eup %1433  ;;  %v1355_v38 = vpop.f32.mrf.mxu0 }
  0xd7   :  { %1369 = vmatmul.mubr.msk.f32.vlgmr.msra.gmra.mxu1 %vm36_vm0, %v1434_v14  ;;  %v1301_v38 = vld [vmem:[%s1645_s1 + $0x4a] ss:$0 sm:$0xff] }
  0xd8   :  { %1372 = vmatpush3.msra.mxu1 %v1482_v2  ;;  %1373 = vmatprep.mubr.msk.f32.mxu1 %vm1458_vm1, %v1457_v0 }
  0xd9   :  { %1376 = vmatprep.subr.mxu1 %v1457_v0 }
  0xdb   :  { %1374 = vmatmul.mubr.msk.f32.vlgmr.msra.gmra.mxu1 %vm36_vm0, %v1434_v14 }
  0xdc   :  { %1377 = vmatpush3.msra.mxu1 %v1503_v4  ;;  %1378 = vmatprep.mubr.msk.f32.mxu1 %vm1458_vm1, %v1457_v0 }
  0xdd   :  { %1386 = vmatprep.subr.mxu1 %v1457_v0 }
 0x197   :  { %v356_v23 = vpop.f32.mrf.mxu1 }
 0x198   :  { %v357_v25 = vadd.f32 %v356_v23, %v283_v16 }
 0x199   :  { %v1370_v26 = vpop.f32.mrf.mxu1 }
 0x19a   :  { %v360_v27 = vadd.f32 %v1562_v22, %v357_v25  ;;  %v18_v25 = vld [vmem:[%s1645_s1 + $0x38] sm:$0xff] }
 0x19b   :  { %v429_v28 = vpop.f32.mrf.mxu1 }
 0x19c   :  { %1435 = vtanh.f32 %v360_v27  ;;  %v433_v29 = vadd.f32 %v429_v28, %v124_v24 }
 0x19d   :  { %v1375_v30 = vpop.f32.mrf.mxu1 }
 0x19e   :  { %1437 = vtanh.f32 %v433_v29 }
 0x1a9   :  { %v1436_v31 = vpop.eup %1435 }
 0x1aa   :  { %362 = vst.msk [vmem:[#allocation2] sm:$0xff] %vm36_vm0, %v1436_v31  ;;  %1379 = vmatmul.mubr.msk.f32.vlgmr.msra.gmra.mxu1 %vm36_vm0, %v1436_v31  ;;  %v19_v31 = vld [vmem:[%s1645_s1 + $0x40] sm:$0xff] }
 0x1ab   :  { %v1438_v32 = vpop.eup %1437  ;;  %1387 = vmatpush3.msra.mxu1 %v1482_v2  ;;  %1388 = vmatprep.mubr.msk.f32.mxu1 %vm1458_vm1, %v1457_v0 }
 0x1ac   :  { %1384 = vmatmul.mubr.msk.f32.vlgmr.msra.gmra.mxu0 %vm36_vm0, %v1438_v32  ;;  %1396 = vmatprep.subr.mxu1 %v1457_v0 }
 0x1ad   :  { %1392 = vmatpush3.msra.mxu0 %v1503_v4  ;;  %1393 = vmatprep.mubr.msk.f32.mxu0 %vm1458_vm1, %v1457_v0 }
 0x1ae   :  { %1389 = vmatmul.mubr.msk.f32.vlgmr.msra.gmra.mxu1 %vm36_vm0, %v1438_v32  ;;  %1401 = vmatprep.subr.mxu0 %v1457_v0 }
 0x1af   :  { %1397 = vmatpush3.msra.mxu1 %v1508_v5  ;;  %1398 = vmatprep.mubr.msk.f32.mxu1 %vm1458_vm1, %v1457_v0 }
 0x1b0   :  { %1406 = vmatprep.subr.mxu1 %v1457_v0 }
 0x1b1   :  { %v1247_v23 = vld [vmem:[#allocation2] sm:$0xff] }
 0x1b2   :  { %v1252_v27 = vmul.f32 %v1247_v23, %v15_v19 }
 0x26a   :  { %v504_v39 = vpop.f32.mrf.mxu1 }
 0x26c   :  { %v1380_v40 = vpop.f32.mrf.mxu1  ;;  %v577_v41 = vpop.f32.mrf.mxu0 }
 0x26d   :  { %v578_v43 = vadd.f32 %v577_v41, %v504_v39 }
 0x26e   :  { %v1385_v44 = vpop.f32.mrf.mxu0  ;;  %v650_v45 = vpop.f32.mrf.mxu1 }
 0x26f   :  { %v581_v46 = vadd.f32 %v1562_v22, %v578_v43  ;;  %v654_v47 = vadd.f32 %v650_v45, %v129_v42 }
 0x270   :  { %v1390_v48 = vpop.f32.mrf.mxu1 }
 0x271   :  { %1439 = vtanh.f32 %v581_v46 }
 0x272   :  { %1441 = vtanh.f32 %v654_v47 }
 0x27e   :  { %v1440_v49 = vpop.eup %1439 }
 0x27f   :  { %v1442_v50 = vpop.eup %1441  ;;  %583 = vst.msk [vmem:[#allocation2 + $0x8] sm:$0xff] %vm36_vm0, %v1440_v49  ;;  %1394 = vmatmul.mubr.msk.f32.vlgmr.msra.gmra.mxu0 %vm36_vm0, %v1440_v49 }
 0x280   :  { %1399 = vmatmul.mubr.msk.f32.vlgmr.msra.gmra.mxu1 %vm36_vm0, %v1442_v50  ;;  %1402 = vmatpush3.msra.mxu0 %v1482_v2 }
 0x281   :  { %1403 = vmatprep.mubr.msk.f32.mxu0 %vm1458_vm1, %v1457_v0  ;;  %1407 = vmatpush3.msra.mxu1 %v1503_v4 }
 0x282   :  { %1411 = vmatprep.subr.mxu0 %v1457_v0  ;;  %1408 = vmatprep.mubr.msk.f32.mxu1 %vm1458_vm1, %v1457_v0 }
 0x283   :  { %1404 = vmatmul.mubr.msk.f32.vlgmr.msra.gmra.mxu0 %vm36_vm0, %v1442_v50  ;;  %1416 = vmatprep.subr.mxu1 %v1457_v0 }
 0x284   :  { %1412 = vmatpush3.msra.mxu0 %v1508_v5  ;;  %1413 = vmatprep.mubr.msk.f32.mxu0 %vm1458_vm1, %v1457_v0 }
 0x285   :  { %1421 = vmatprep.subr.mxu0 %v1457_v0 }
 0x286   :  { %v1248_v18 = vld [vmem:[#allocation2 + $0x8] sm:$0xff] }
 0x33f   :  { %v725_v51 = vpop.f32.mrf.mxu0 }
 0x340   :  { %v798_v52 = vpop.f32.mrf.mxu1 }
 0x341   :  { %v799_v53 = vadd.f32 %v798_v52, %v725_v51  ;;  %v1395_v54 = vpop.f32.mrf.mxu0 }
 0x342   :  { %v1400_v56 = vpop.f32.mrf.mxu1 }
 0x343   :  { %v802_v57 = vadd.f32 %v1562_v22, %v799_v53  ;;  %v871_v58 = vpop.f32.mrf.mxu0 }
 0x344   :  { %v875_v59 = vadd.f32 %v871_v58, %v134_v55 }
 0x345   :  { %1443 = vtanh.f32 %v802_v57  ;;  %v1405_v60 = vpop.f32.mrf.mxu0 }
 0x346   :  { %1445 = vtanh.f32 %v875_v59 }
 0x352   :  { %v1444_v61 = vpop.eup %1443 }
 0x353   :  { %v1446_v62 = vpop.eup %1445  ;;  %804 = vst.msk [vmem:[#allocation2 + $0x10] sm:$0xff] %vm36_vm0, %v1444_v61  ;;  %1409 = vmatmul.mubr.msk.f32.vlgmr.msra.gmra.mxu1 %vm36_vm0, %v1444_v61 }
 0x354   :  { %1417 = vmatpush3.msra.mxu1 %v1482_v2  ;;  %1414 = vmatmul.mubr.msk.f32.vlgmr.msra.gmra.mxu0 %vm36_vm0, %v1446_v62 }
 0x355   :  { %1418 = vmatprep.mubr.msk.f32.mxu1 %vm1458_vm1, %v1457_v0  ;;  %1426 = vmatprep.subr.mxu1 %v1457_v0 }
 0x356   :  { %1422 = vmatpush3.msra.mxu0 %v1503_v4  ;;  %1423 = vmatprep.mubr.msk.f32.mxu0 %vm1458_vm1, %v1457_v0 }
 0x357   :  { %1419 = vmatmul.mubr.msk.f32.vlgmr.msra.gmra.mxu1 %vm36_vm0, %v1446_v62 }
 0x358   :  { %1427 = vmatpush3.msra.mxu1 %v1508_v5  ;;  %1428 = vmatprep.mubr.msk.f32.mxu1 %vm1458_vm1, %v1457_v0 }
 0x35a   :  { %v1249_v24 = vld [vmem:[#allocation2 + $0x10] sm:$0xff] }
 0x35b   :  { %v1254_v28 = vmul.f32 %v1249_v24, %v17_v21 }
 0x413   :  { %v946_v63 = vpop.f32.mrf.mxu1 }
 0x414   :  { %v1019_v1 = vpop.f32.mrf.mxu0 }
 0x415   :  { %v1410_v2 = vpop.f32.mrf.mxu1  ;;  %v1020_v3 = vadd.f32 %v1019_v1, %v946_v63 }
 0x416   :  { %v1415_v8 = vpop.f32.mrf.mxu0 }
 0x417   :  { %v1023_v9 = vadd.f32 %v1562_v22, %v1020_v3  ;;  %v1092_v4 = vpop.f32.mrf.mxu1 }
 0x418   :  { %v1096_v10 = vadd.f32 %v1092_v4, %v139_v6 }
 0x419   :  { %1447 = vtanh.f32 %v1023_v9  ;;  %v1420_v11 = vpop.f32.mrf.mxu1 }
 0x41a   :  { %1449 = vtanh.f32 %v1096_v10 }
 0x426   :  { %v1448_v12 = vpop.eup %1447 }
 0x427   :  { %v1450_v13 = vpop.eup %1449  ;;  %1025 = vst.msk [vmem:[#allocation2 + $0x18] sm:$0xff] %vm36_vm0, %v1448_v12  ;;  %1424 = vmatmul.mubr.msk.f32.vlgmr.msra.gmra.mxu0 %vm36_vm0, %v1448_v12 }
 0x428   :  { %1429 = vmatmul.mubr.msk.f32.vlgmr.msra.gmra.mxu1 %vm36_vm0, %v1450_v13 }
 0x42e   :  { %v1250_v26 = vld [vmem:[#allocation2 + $0x18] sm:$0xff] }
 0x42f   :  { %v1255_v29 = vmul.f32 %v1250_v26, %v18_v25 }
 0x4e7   :  { %v1167_v0 = vpop.f32.mrf.mxu0 }
 0x4e8   :  { %v1240_v5 = vpop.f32.mrf.mxu1 }
 0x4e9   :  { %v1241_v14 = vadd.f32 %v1240_v5, %v1167_v0  ;;  %v1425_v7 = vpop.f32.mrf.mxu0 }
 0x4ea   :  { %v1430_v15 = vpop.f32.mrf.mxu1 }
 0x4eb   :  { %v1244_v16 = vadd.f32 %v1562_v22, %v1241_v14  ;;  %v1253_v22 = vmul.f32 %v1248_v18, %v16_v17 }
 0x4ed   :  { %1451 = vtanh.f32 %v1244_v16  ;;  %v1257_v30 = vadd.f32 %v1253_v22, %v1252_v27 }
 0x4ef   :  { %v1258_v32 = vadd.f32 %v1257_v30, %v1254_v28 }
 0x4f1   :  { %v1259_v35 = vadd.f32 %v1258_v32, %v1255_v29 }
 0x4fa   :  { %v1452_v20 = vpop.eup %1451 }
 0x4fb   :  { %1246 = vst.msk [vmem:[#allocation2 + $0x20] sm:$0xff] %vm36_vm0, %v1452_v20 }
 0x502   :  { %v1251_v33 = vld [vmem:[#allocation2 + $0x20] sm:$0xff] }
 0x503   :  { %v1256_v34 = vmul.f32 %v1251_v33, %v19_v31 }
 0x505   :  { %v1260_v36 = vadd.f32 %v1259_v35, %v1256_v34 }
 0x507   :  { %v1261_v37 = vsel %vm36_vm0, %v1260_v36, 0.0 }
 0x508   :  { %1262 = vadd.xlane.f32.xlu0 %v1261_v37 }
 0x591   :  { %v1263_v39 = vpop.xlane.xlu0 %1262 }
 0x592   :  { %v1268_v40 = vadd.f32 %v1301_v38, %v1263_v39 }
 0x594   :  { %v1302_v41 = vmul.f32 -1.442695, %v1268_v40 }
 0x596   :  { %1453 = vpow2.f32 %v1302_v41 }
 0x5a3   :  { %v1454_v42 = vpop.eup %1453 }
 0x5a4   :  { %v1272_v43 = vadd.f32 1.0, %v1454_v42 }
 0x5a6   :  { %1455 = vrcp.f32 %v1272_v43 }
 0x5b3   :  { %v1456_v44 = vpop.eup %1455 }
 0x5b4   :  { %1276 = vst.msk [vmem:[%s1647_s2] sm:$0xff] %vm1275_vm2, %v1456_v44 }

</bundles_post_ra>
